<compile_context>
chip_gen: v6e
topology: v6e:2x2x1
jax: 0.10.0
libtpu: 0.0.40
codegen_flags: <defaults>
</compile_context>

<pallas_src>
import functools

import jax
import jax.numpy as jnp
from jax.experimental import pallas as pl
from jax.experimental.pallas import tpu as pltpu


def _round_up(x, m):
    return ((x + m - 1) // m) * m


def _mlp_kernel(x_ref, w1_ref, b1_ref, w2_ref, b2_ref, w3_ref, b3_ref,
                o_ref, h1_acc):
    """Grid = (batch_blocks, k_blocks).  K (fc1 reduction) is the last axis."""
    k = pl.program_id(1)

    @pl.when(k == 0)
    def _():
        h1_acc[...] = jnp.zeros_like(h1_acc)

    # Partial fc1: accumulate x[:, k*tk:(k+1)*tk] @ w1[k*tk:(k+1)*tk, :] in f32.
    h1_acc[...] += jnp.dot(
        x_ref[...].astype(jnp.bfloat16), w1_ref[...],
        preferred_element_type=jnp.float32)

    @pl.when(k == pl.num_programs(1) - 1)
    def _():
        # fc1 bias + ReLU (dropout is identity in eval mode)
        h1 = jnp.maximum(h1_acc[...] + b1_ref[...], 0.0)
        # fc2 + ReLU
        h2 = jnp.dot(h1.astype(jnp.bfloat16), w2_ref[...],
                     preferred_element_type=jnp.float32)
        h2 = jnp.maximum(h2 + b2_ref[...], 0.0)
        # fc3 (logits)
        out = jnp.dot(h2.astype(jnp.bfloat16), w3_ref[...],
                      preferred_element_type=jnp.float32) + b3_ref[...]
        o_ref[...] = out.astype(o_ref.dtype)


def _vmem_limit_bytes(b_tile, tk, c_pad):
    """Size the VMEM budget from the actual block shapes, with headroom."""
    bytes_ = 0
    bytes_ += 2 * b_tile * tk * 4        # x tile, double-buffered (f32)
    bytes_ += 2 * tk * 512 * 2           # w1 tile, double-buffered (bf16)
    bytes_ += 512 * 128 * 2              # resident w2 (bf16)
    bytes_ += 128 * c_pad * 2            # resident w3 (bf16)
    bytes_ += (512 + 128 + c_pad) * 4    # biases (f32)
    bytes_ += b_tile * 512 * 4           # h1 accumulator scratch (f32)
    bytes_ += 2 * b_tile * c_pad * 4     # output tile, double-buffered (f32)
    # 1.5x + 4 MiB headroom for compiler scratch; cap well below v7x's 64 MiB.
    return min(int(bytes_ * 1.5) + (4 << 20), 48 << 20)


@functools.partial(jax.jit, static_argnames=("tk", "b_tile"))
def simple_nn_forward(x_nchw, params, *, tk=1024, b_tile=128):
    """x_nchw: [B, 3, H, W] float32.  params: transposed weights/biases (f32)."""
    B = x_nchw.shape[0]
    x_flat = x_nchw.reshape(B, -1)       # same row-major flatten as torch .view(B, -1)
    D = x_flat.shape[1]

    w1, b1 = params["w1"], params["b1"]  # (D, 512),   (1, 512)
    w2, b2 = params["w2"], params["b2"]  # (512, 128), (1, 128)
    w3, b3 = params["w3"], params["b3"]  # (128, C),   (1, C)
    num_classes = w3.shape[1]

    # ---- padding / tiling parameters -------------------------------------
    b_tile = min(b_tile, _round_up(B, 8))            # sublane-aligned batch tile
    B_pad = _round_up(B, b_tile)
    tk = min(tk, _round_up(D, 128))                  # lane-aligned K tile
    D_pad = _round_up(D, tk)
    C_pad = _round_up(num_classes, 128)              # lane-dense output

    n_b = B_pad // b_tile
    n_k = D_pad // tk

    # ---- pad operands (zeros contribute nothing to the matmuls) ----------
    x_p = jnp.pad(x_flat, ((0, B_pad - B), (0, D_pad - D)))
    w1_p = jnp.pad(w1, ((0, D_pad - D), (0, 0))).astype(jnp.bfloat16)
    w2_b = w2.astype(jnp.bfloat16)
    w3_p = jnp.pad(w3, ((0, 0), (0, C_pad - num_classes))).astype(jnp.bfloat16)
    b3_p = jnp.pad(b3, ((0, 0), (0, C_pad - num_classes)))

    const = lambda shape: pl.BlockSpec(shape, lambda b, k: (0, 0))  # resident

    out_pad = pl.pallas_call(
        _mlp_kernel,
        out_shape=jax.ShapeDtypeStruct((B_pad, C_pad), jnp.float32),
        grid_spec=pltpu.PrefetchScalarGridSpec(
            num_scalar_prefetch=0,
            grid=(n_b, n_k),
            in_specs=[
                pl.BlockSpec((b_tile, tk), lambda b, k: (b, k)),   # x
                pl.BlockSpec((tk, 512), lambda b, k: (k, 0)),      # w1 (streamed)
                const((1, 512)),                                   # b1
                const((512, 128)),                                 # w2
                const((1, 128)),                                   # b2
                const((128, C_pad)),                               # w3
                const((1, C_pad)),                                 # b3
            ],
            out_specs=pl.BlockSpec((b_tile, C_pad), lambda b, k: (b, 0)),
            scratch_shapes=[pltpu.VMEM((b_tile, 512), jnp.float32)],
        ),
        compiler_params=pltpu.CompilerParams(
            dimension_semantics=("parallel", "arbitrary"),
            vmem_limit_bytes=_vmem_limit_bytes(b_tile, tk, C_pad),
        ),
    )(x_p, w1_p, b1, w2_b, b2, w3_p, b3_p)

    return out_pad[:B, :num_classes]


def init_params(key, flattened_dim, num_classes):
    """Deterministic synthetic params (PyTorch Linear stores (out,in); we store W.T)."""
    k1, k2, k3, k4, k5, k6 = jax.random.split(key, 6)

    def lin(kw, kb, fan_in, fan_out):
        bound = 1.0 / jnp.sqrt(fan_in)
        w = jax.random.uniform(kw, (fan_in, fan_out), jnp.float32, -bound, bound)
        b = jax.random.uniform(kb, (1, fan_out), jnp.float32, -bound, bound)
        return w, b

    w1, b1 = lin(k1, k2, flattened_dim, 512)
    w2, b2 = lin(k3, k4, 512, 128)
    w3, b3 = lin(k5, k6, 128, num_classes)
    return {"w1": w1, "b1": b1, "w2": w2, "b2": b2, "w3": w3, "b3": b3}


if __name__ == "__main__":
    # Small shapes consistent with the module: input_size=16 -> D = 3*16*16 = 768.
    batch, channels, input_size, num_classes = 2, 3, 16, 10
    flattened_dim = channels * input_size * input_size

    key = jax.random.PRNGKey(0)
    kx, kp = jax.random.split(key)
    x = jax.random.normal(kx, (batch, channels, input_size, input_size), jnp.float32)
    params = init_params(kp, flattened_dim, num_classes)

    # tk=256 -> 3 K-steps at this toy size, exercising the accumulator path.
    out = simple_nn_forward(x, params, tk=256)
    jax.block_until_ready(out)

    # Reference: same math with bf16 weights / f32 accumulation (matches kernel dtypes).
    w1b = params["w1"].astype(jnp.bfloat16)
    w2b = params["w2"].astype(jnp.bfloat16)
    w3b = params["w3"].astype(jnp.bfloat16)
    x_flat = x.reshape(batch, -1)
    h1 = jnp.maximum(
        jnp.dot(x_flat.astype(jnp.bfloat16), w1b,
                preferred_element_type=jnp.float32) + params["b1"], 0.0)
    h2 = jnp.maximum(
        jnp.dot(h1.astype(jnp.bfloat16), w2b,
                preferred_element_type=jnp.float32) + params["b2"], 0.0)
    ref = jnp.dot(h2.astype(jnp.bfloat16), w3b,
                  preferred_element_type=jnp.float32) + params["b3"]

    assert out.shape == (batch, num_classes)
    assert jnp.allclose(out, ref, atol=1e-2, rtol=1e-2), (
        f"max abs err {jnp.max(jnp.abs(out - ref))}")

    print("KERNEL_OK")
</pallas_src>

<mosaic_0001>
module attributes {stable_mosaic.version = 11 : i64} {
  func.func @_mlp_kernel(%arg0: i32, %arg1: i32, %arg2: memref<8x256xf32, #tpu.memory_space<vmem>>, %arg3: memref<256x512xbf16, #tpu.memory_space<vmem>>, %arg4: memref<1x512xf32, #tpu.memory_space<vmem>>, %arg5: memref<512x128xbf16, #tpu.memory_space<vmem>>, %arg6: memref<1x128xf32, #tpu.memory_space<vmem>>, %arg7: memref<128x128xbf16, #tpu.memory_space<vmem>>, %arg8: memref<1x128xf32, #tpu.memory_space<vmem>>, %arg9: memref<8x128xf32, #tpu.memory_space<vmem>>, %arg10: memref<8x512xf32, #tpu.memory_space<vmem>>) attributes {dimension_semantics = [#tpu.dimension_semantics<parallel>, #tpu.dimension_semantics<arbitrary>], iteration_bounds = array<i64: 1, 3>, scalar_prefetch = 0 : i64, scratch_operands = 1 : i64, tpu.core_type = #tpu.core_type<tc>, window_params = [{transform_indices = @transform_0, window_bounds = array<i64: 8, 256>}, {transform_indices = @transform_1, window_bounds = array<i64: 256, 512>}, {pipeline_mode = #tpu.pipeline_mode<synchronous>, transform_indices = @transform_2, window_bounds = array<i64: 1, 512>}, {pipeline_mode = #tpu.pipeline_mode<synchronous>, transform_indices = @transform_3, window_bounds = array<i64: 512, 128>}, {pipeline_mode = #tpu.pipeline_mode<synchronous>, transform_indices = @transform_4, window_bounds = array<i64: 1, 128>}, {pipeline_mode = #tpu.pipeline_mode<synchronous>, transform_indices = @transform_5, window_bounds = array<i64: 128, 128>}, {pipeline_mode = #tpu.pipeline_mode<synchronous>, transform_indices = @transform_6, window_bounds = array<i64: 1, 128>}, {transform_indices = @transform_7, window_bounds = array<i64: 8, 128>}]} {
    %c0_i32 = arith.constant 0 : i32
    %0 = arith.cmpi eq, %arg1, %c0_i32 : i32
    %1 = arith.extui %0 : i1 to i32
    %c0_i32_0 = arith.constant 0 : i32
    %2 = arith.cmpi ne, %1, %c0_i32_0 : i32
    scf.if %2 {
      %cst_9 = arith.constant 0.000000e+00 : f32
      %13 = vector.broadcast %cst_9 : f32 to vector<8x512xf32>
      %c0_10 = arith.constant 0 : index
      %c0_11 = arith.constant 0 : index
      %14 = vector.load %arg10[%c0_10, %c0_11] : memref<8x512xf32, #tpu.memory_space<vmem>>, vector<8x512xf32>
      tpu.vector_store %arg10[%c0_10, %c0_11], %13 {strides = array<i32>} : memref<8x512xf32, #tpu.memory_space<vmem>>, vector<8x512xf32>,
    } else {
    }
    %c0 = arith.constant 0 : index
    %c0_1 = arith.constant 0 : index
    %3 = vector.load %arg10[%c0, %c0_1] : memref<8x512xf32, #tpu.memory_space<vmem>>, vector<8x512xf32>
    %c0_2 = arith.constant 0 : index
    %c0_3 = arith.constant 0 : index
    %4 = vector.load %arg2[%c0_2, %c0_3] : memref<8x256xf32, #tpu.memory_space<vmem>>, vector<8x256xf32>
    %5 = arith.truncf %4 : vector<8x256xf32> to vector<8x256xbf16>
    %c0_4 = arith.constant 0 : index
    %c0_5 = arith.constant 0 : index
    %6 = vector.load %arg3[%c0_4, %c0_5] : memref<256x512xbf16, #tpu.memory_space<vmem>>, vector<256x512xbf16>
    %cst = arith.constant dense<0.000000e+00> : vector<8x512xf32>
    %7 = tpu.matmul %5, %6, %cst {dimension_numbers = #tpu.dot_dimension_numbers<[1], [0], [0], [1], [0, 0, 1, 1], [], []>} : vector<8x256xbf16>, vector<256x512xbf16>, vector<8x512xf32> -> vector<8x512xf32>
    %8 = arith.addf %3, %7 : vector<8x512xf32>
    %c0_6 = arith.constant 0 : index
    %c0_7 = arith.constant 0 : index
    %9 = vector.load %arg10[%c0_6, %c0_7] : memref<8x512xf32, #tpu.memory_space<vmem>>, vector<8x512xf32>
    tpu.vector_store %arg10[%c0_6, %c0_7], %8 {strides = array<i32>} : memref<8x512xf32, #tpu.memory_space<vmem>>, vector<8x512xf32>,
    %c2_i32 = arith.constant 2 : i32
    %10 = arith.cmpi eq, %arg1, %c2_i32 : i32
    %11 = arith.extui %10 : i1 to i32
    %c0_i32_8 = arith.constant 0 : i32
    %12 = arith.cmpi ne, %11, %c0_i32_8 : i32
    scf.if %12 {
      %c0_9 = arith.constant 0 : index
      %c0_10 = arith.constant 0 : index
      %13 = vector.load %arg10[%c0_9, %c0_10] : memref<8x512xf32, #tpu.memory_space<vmem>>, vector<8x512xf32>
      %c0_11 = arith.constant 0 : index
      %c0_12 = arith.constant 0 : index
      %14 = vector.load %arg4[%c0_11, %c0_12] : memref<1x512xf32, #tpu.memory_space<vmem>>, vector<1x512xf32>
      %15 = vector.broadcast %14 : vector<1x512xf32> to vector<8x512xf32>
      %16 = arith.addf %13, %15 : vector<8x512xf32>
      %cst_13 = arith.constant 0.000000e+00 : f32
      %17 = vector.broadcast %cst_13 : f32 to vector<8x512xf32>
      %18 = arith.maximumf %16, %17 : vector<8x512xf32>
      %19 = arith.truncf %18 : vector<8x512xf32> to vector<8x512xbf16>
      %c0_14 = arith.constant 0 : index
      %c0_15 = arith.constant 0 : index
      %20 = vector.load %arg5[%c0_14, %c0_15] : memref<512x128xbf16, #tpu.memory_space<vmem>>, vector<512x128xbf16>
      %cst_16 = arith.constant dense<0.000000e+00> : vector<8x128xf32>
      %21 = tpu.matmul %19, %20, %cst_16 {dimension_numbers = #tpu.dot_dimension_numbers<[1], [0], [0], [1], [0, 0, 1, 1], [], []>} : vector<8x512xbf16>, vector<512x128xbf16>, vector<8x128xf32> -> vector<8x128xf32>
      %c0_17 = arith.constant 0 : index
      %c0_18 = arith.constant 0 : index
      %22 = vector.load %arg6[%c0_17, %c0_18] : memref<1x128xf32, #tpu.memory_space<vmem>>, vector<1x128xf32>
      %23 = vector.broadcast %22 : vector<1x128xf32> to vector<8x128xf32>
      %24 = arith.addf %21, %23 : vector<8x128xf32>
      %cst_19 = arith.constant 0.000000e+00 : f32
      %25 = vector.broadcast %cst_19 : f32 to vector<8x128xf32>
      %26 = arith.maximumf %24, %25 : vector<8x128xf32>
      %27 = arith.truncf %26 : vector<8x128xf32> to vector<8x128xbf16>
      %c0_20 = arith.constant 0 : index
      %c0_21 = arith.constant 0 : index
      %28 = vector.load %arg7[%c0_20, %c0_21] : memref<128x128xbf16, #tpu.memory_space<vmem>>, vector<128x128xbf16>
      %cst_22 = arith.constant dense<0.000000e+00> : vector<8x128xf32>
      %29 = tpu.matmul %27, %28, %cst_22 {dimension_numbers = #tpu.dot_dimension_numbers<[1], [0], [0], [1], [0, 0, 1, 1], [], []>} : vector<8x128xbf16>, vector<128x128xbf16>, vector<8x128xf32> -> vector<8x128xf32>
      %c0_23 = arith.constant 0 : index
      %c0_24 = arith.constant 0 : index
      %30 = vector.load %arg8[%c0_23, %c0_24] : memref<1x128xf32, #tpu.memory_space<vmem>>, vector<1x128xf32>
      %31 = vector.broadcast %30 : vector<1x128xf32> to vector<8x128xf32>
      %32 = arith.addf %29, %31 : vector<8x128xf32>
      %c0_25 = arith.constant 0 : index
      %c0_26 = arith.constant 0 : index
      %33 = vector.load %arg9[%c0_25, %c0_26] : memref<8x128xf32, #tpu.memory_space<vmem>>, vector<8x128xf32>
      tpu.vector_store %arg9[%c0_25, %c0_26], %32 {strides = array<i32>} : memref<8x128xf32, #tpu.memory_space<vmem>>, vector<8x128xf32>,
    } else {
    }
    return
  }
  func.func @transform_0(%arg0: i32, %arg1: i32) -> (i32, i32) {
    %c0_i32 = arith.constant 0 : i32
    return %arg0, %arg1 : i32, i32
  }
  func.func @transform_1(%arg0: i32, %arg1: i32) -> (i32, i32) {
    %c0_i32 = arith.constant 0 : i32
    %c0_i32_0 = arith.constant 0 : i32
    return %arg1, %c0_i32 : i32, i32
  }
  func.func @transform_2(%arg0: i32, %arg1: i32) -> (i32, i32) {
    %c0_i32 = arith.constant 0 : i32
    %c0_i32_0 = arith.constant 0 : i32
    %c0_i32_1 = arith.constant 0 : i32
    return %c0_i32, %c0_i32_0 : i32, i32
  }
  func.func @transform_3(%arg0: i32, %arg1: i32) -> (i32, i32) {
    %c0_i32 = arith.constant 0 : i32
    %c0_i32_0 = arith.constant 0 : i32
    %c0_i32_1 = arith.constant 0 : i32
    return %c0_i32, %c0_i32_0 : i32, i32
  }
  func.func @transform_4(%arg0: i32, %arg1: i32) -> (i32, i32) {
    %c0_i32 = arith.constant 0 : i32
    %c0_i32_0 = arith.constant 0 : i32
    %c0_i32_1 = arith.constant 0 : i32
    return %c0_i32, %c0_i32_0 : i32, i32
  }
  func.func @transform_5(%arg0: i32, %arg1: i32) -> (i32, i32) {
    %c0_i32 = arith.constant 0 : i32
    %c0_i32_0 = arith.constant 0 : i32
    %c0_i32_1 = arith.constant 0 : i32
    return %c0_i32, %c0_i32_0 : i32, i32
  }
  func.func @transform_6(%arg0: i32, %arg1: i32) -> (i32, i32) {
    %c0_i32 = arith.constant 0 : i32
    %c0_i32_0 = arith.constant 0 : i32
    %c0_i32_1 = arith.constant 0 : i32
    return %c0_i32, %c0_i32_0 : i32, i32
  }
  func.func @transform_7(%arg0: i32, %arg1: i32) -> (i32, i32) {
    %c0_i32 = arith.constant 0 : i32
    %c0_i32_0 = arith.constant 0 : i32
    return %arg0, %c0_i32 : i32, i32
  }
}

</mosaic_0001>

<bundles_post_ra>
// kernel: simple_nn_forward.1
= control target key start
LH: loop header
LB: loop body
LE: loop exit
PB: predicated region body
PF: predicated region fallthrough
CT: control target
= control target key end

     0   :  { %s1821_s24 = smov 0   ;;  %s1823_s25 = smov 0   ;;  %s2062_s0 = inlined_call_operand.vmem [shape: f32[8,768], index: 0, kind: input, shape index: {}]   ;;  %s2063_s1 = inlined_call_operand.vmem [shape: bf16[768,512], index: 1, kind: input, shape index: {}]   ;;  %s2064_s2 = inlined_call_operand.vmem [shape: f32[1,512], index: 2, kind: input, shape index: {}]   ;;  %s2065_s3 = inlined_call_operand.vmem [shape: bf16[512,128], index: 3, kind: input, shape index: {}]   ;;  %s2066_s4 = inlined_call_operand.vmem [shape: f32[1,128], index: 4, kind: input, shape index: {}]   ;;  %s2067_s5 = inlined_call_operand.vmem [shape: bf16[128,128], index: 5, kind: input, shape index: {}]   ;;  %s2068_s6 = inlined_call_operand.vmem [shape: f32[1,128], index: 6, kind: input, shape index: {}]   ;;  %s2069_s7 = inlined_call_operand.vmem [shape: f32[8,128], index: 7, kind: output, shape index: {}]  }
   0x1   :  { %s1825_s26 = smov 0  }
   0x2 LB: > { %s26_s27 = sadd.s32 1, %s1772_s25  ;;  %p1400_p0 = scmp.ge.s32.totalorder %s1776_s26, 1  ;;  %s1776_s26 = sphi %s1825_s26, %s17_s26   ;;  %s1772_s25 = sphi %s1823_s25, %s2071_s25   ;;  %s1768_s24 = sphi %s1821_s24, %s2070_s24  }
   0x3   : > { %p27_p1 = scmp.ge.s32.totalorder %s26_s27, 3  ;;  %p268_p2 = scmp.lt.s32.totalorder %s1776_s26, 4 }
   0x5   : > { %s2073_s27 = smov (%p27_p1, %s26_s27), 0  ;;  %p269_p3 = pnand %p1400_p0, %p268_p2 }
   0x6   : > { %s1401_s28 = sshll.u32 (!%p269_p3), %s1768_s24, 1  ;;  %s1403_s29 = sshll.u32 (!%p269_p3), %s1768_s24, 5 }
   0x7   : > { %272 = sbr.rel (%p269_p3) target bundleno = 725 (0x2d5), region = 48  ;;  %p312_p4 = scmp.lt.s32.totalorder (!%p269_p3), %s1401_s28, 5 }
   0x8   : > { %p320_p5 = scmp.lt.s32.totalorder (!%p269_p3), %s1403_s29, 95  ;;  %p1406_p6 = scmp.ne.s32.totalorder (!%p269_p3), %s1768_s24, 0 }
   0xc   : > { %s2075_s28 = smov (!%p312_p4, %s1401_s28), 5  ;;  %s2077_s29 = smov (!%p320_p5, %s1403_s29), 95 }
   0xd   : > { %s1402_s30 = sshll.u32 %s2075_s28, 3  ;;  %s1517_s11 = sshll.u32 %s2077_s29, 4 }
   0xe   : > { %s1846_s10 = scalar_lea.vmem %s2062_s0, %s1402_s30  ;;  %s1851_s14 = scalar_lea.vmem %s2063_s1, %s1517_s11 }
   0xf   : > { %334 = sbr.rel (%p1406_p6) target bundleno = 23 (0x17), region = 52 }
  0x14   : > { %v1778_v0 = vmov 0.0  }
  0x15   : > { %335 = vst [vmem:[#allocation2 + $0x10] sm:$0xff] %v1778_v0  ;;  %336 = vst [vmem:[#allocation2] sm:$0xff] %v1778_v0 }
  0x16   : > { %337 = vst [vmem:[#allocation2 + $0x18] sm:$0xff] %v1778_v0  ;;  %338 = vst [vmem:[#allocation2 + $0x8] sm:$0xff] %v1778_v0 }
  0x17 PF: > { %v1618_v1 = vld [vmem:[%s1851_s14 + $0xe4] ss:$16 sps:$4 sm:$0xff]   ;;  %v1620_v2 = vld [vmem:[%s1851_s14 + $0xec] ss:$16 sps:$4 sm:$0xff]   ;;  %v1622_v3 = vld [vmem:[%s1851_s14 + $0xe0] ss:$16 sps:$4 sm:$0xff]  }
  0x18   : > { %731 = vmatprep.subr.bf16.mxu0 %v1618_v1  ;;  %v1623_v4 = vld [vmem:[%s1851_s14 + $0xe8] ss:$16 sps:$4 sm:$0xff]   ;;  %772 = vmatprep.subr.bf16.mxu1 %v1620_v2  ;;  %v1624_v5 = vld [vmem:[%s1851_s14 + $0xc4] ss:$16 sps:$4 sm:$0xff]   ;;  %v1626_v6 = vld [vmem:[%s1851_s14 + $0xcc] ss:$16 sps:$4 sm:$0xff]  }
  0x19   : > { %732 = vmatpush1.bf16.msra.mxu0 %v1622_v3  ;;  %773 = vmatpush1.bf16.msra.mxu1 %v1623_v4  ;;  %v1628_v7 = vld [vmem:[%s1851_s14 + $0xc0] ss:$16 sps:$4 sm:$0xff]   ;;  %v1629_v8 = vld [vmem:[%s1851_s14 + $0xc8] ss:$16 sps:$4 sm:$0xff]   ;;  %v1630_v9 = vld [vmem:[%s1851_s14 + $0xa4] ss:$16 sps:$4 sm:$0xff]  }
  0x1a   : > { %733 = vmatprep.subr.bf16.mxu0 %v1624_v5  ;;  %774 = vmatprep.subr.bf16.mxu1 %v1626_v6  ;;  %v1632_v10 = vld [vmem:[%s1851_s14 + $0xac] ss:$16 sps:$4 sm:$0xff]   ;;  %v1634_v11 = vld [vmem:[%s1851_s14 + $0xa0] ss:$16 sps:$4 sm:$0xff]   ;;  %v1635_v12 = vld [vmem:[%s1851_s14 + $0xa8] ss:$16 sps:$4 sm:$0xff]  }
  0x1b   : > { %v1636_v13 = vld [vmem:[%s1851_s14 + $0x84] ss:$16 sps:$4 sm:$0xff]   ;;  %v1638_v14 = vld [vmem:[%s1851_s14 + $0x8c] ss:$16 sps:$4 sm:$0xff]   ;;  %v1640_v15 = vld [vmem:[%s1851_s14 + $0x80] ss:$16 sps:$4 sm:$0xff]  }
  0x1c   : > { %v1641_v16 = vld [vmem:[%s1851_s14 + $0x88] ss:$16 sps:$4 sm:$0xff]   ;;  %v1642_v17 = vld [vmem:[%s1851_s14 + $0x64] ss:$16 sps:$4 sm:$0xff]   ;;  %v1644_v18 = vld [vmem:[%s1851_s14 + $0x6c] ss:$16 sps:$4 sm:$0xff]  }
  0x1d   : > { %734 = vmatpush1.bf16.msra.mxu0 %v1628_v7  ;;  %775 = vmatpush1.bf16.msra.mxu1 %v1629_v8  ;;  %v1646_v19 = vld [vmem:[%s1851_s14 + $0x60] ss:$16 sps:$4 sm:$0xff]   ;;  %v1647_v20 = vld [vmem:[%s1851_s14 + $0x68] ss:$16 sps:$4 sm:$0xff]   ;;  %v1648_v21 = vld [vmem:[%s1851_s14 + $0x44] ss:$16 sps:$4 sm:$0xff]  }
  0x1e   : > { %735 = vmatprep.subr.bf16.mxu0 %v1630_v9  ;;  %776 = vmatprep.subr.bf16.mxu1 %v1632_v10  ;;  %v1650_v22 = vld [vmem:[%s1851_s14 + $0x4c] ss:$16 sps:$4 sm:$0xff]   ;;  %v1652_v23 = vld [vmem:[%s1851_s14 + $0x40] ss:$16 sps:$4 sm:$0xff]   ;;  %v1653_v24 = vld [vmem:[%s1851_s14 + $0x48] ss:$16 sps:$4 sm:$0xff]  }
  0x1f   : > { %v1654_v25 = vld [vmem:[%s1851_s14 + $0x24] ss:$16 sps:$4 sm:$0xff]   ;;  %v1656_v26 = vld [vmem:[%s1851_s14 + $0x2c] ss:$16 sps:$4 sm:$0xff]   ;;  %v1658_v27 = vld [vmem:[%s1851_s14 + $0x20] ss:$16 sps:$4 sm:$0xff]  }
  0x20   : > { %v1659_v28 = vld [vmem:[%s1851_s14 + $0x28] ss:$16 sps:$4 sm:$0xff]   ;;  %v1660_v29 = vld [vmem:[%s1851_s14 + $0x4] ss:$16 sps:$4 sm:$0xff]   ;;  %v1662_v30 = vld [vmem:[%s1851_s14 + $0xc] ss:$16 sps:$4 sm:$0xff]  }
  0x21   : > { %736 = vmatpush1.bf16.msra.mxu0 %v1634_v11  ;;  %777 = vmatpush1.bf16.msra.mxu1 %v1635_v12  ;;  %v1664_v31 = vld [vmem:[%s1851_s14] ss:$16 sps:$4 sm:$0xff]   ;;  %v1665_v32 = vld [vmem:[%s1851_s14 + $0x8] ss:$16 sps:$4 sm:$0xff]   ;;  %v1666_v33 = vld [vmem:[%s1851_s14 + $0x1e4] ss:$16 sps:$4 sm:$0xff]  }
  0x22   : > { %737 = vmatprep.subr.bf16.mxu0 %v1636_v13  ;;  %778 = vmatprep.subr.bf16.mxu1 %v1638_v14  ;;  %v1668_v34 = vld [vmem:[%s1851_s14 + $0x1ec] ss:$16 sps:$4 sm:$0xff]   ;;  %v1670_v35 = vld [vmem:[%s1851_s14 + $0x1e0] ss:$16 sps:$4 sm:$0xff]   ;;  %v1671_v36 = vld [vmem:[%s1851_s14 + $0x1e8] ss:$16 sps:$4 sm:$0xff]  }
  0x23   : > { %v1672_v37 = vld [vmem:[%s1851_s14 + $0x1c4] ss:$16 sps:$4 sm:$0xff]   ;;  %v1674_v38 = vld [vmem:[%s1851_s14 + $0x1cc] ss:$16 sps:$4 sm:$0xff]   ;;  %v1676_v39 = vld [vmem:[%s1851_s14 + $0x1c0] ss:$16 sps:$4 sm:$0xff]  }
  0x24   : > { %v1677_v40 = vld [vmem:[%s1851_s14 + $0x1c8] ss:$16 sps:$4 sm:$0xff]   ;;  %v1678_v41 = vld [vmem:[%s1851_s14 + $0x1a4] ss:$16 sps:$4 sm:$0xff]   ;;  %v1680_v42 = vld [vmem:[%s1851_s14 + $0x1ac] ss:$16 sps:$4 sm:$0xff]  }
  0x25   : > { %738 = vmatpush1.bf16.msra.mxu0 %v1640_v15  ;;  %779 = vmatpush1.bf16.msra.mxu1 %v1641_v16  ;;  %v1682_v43 = vld [vmem:[%s1851_s14 + $0x1a0] ss:$16 sps:$4 sm:$0xff]   ;;  %v1683_v44 = vld [vmem:[%s1851_s14 + $0x1a8] ss:$16 sps:$4 sm:$0xff]   ;;  %v1684_v45 = vld [vmem:[%s1851_s14 + $0x184] ss:$16 sps:$4 sm:$0xff]  }
  0x26   : > { %739 = vmatprep.subr.bf16.mxu0 %v1642_v17  ;;  %780 = vmatprep.subr.bf16.mxu1 %v1644_v18  ;;  %v1686_v46 = vld [vmem:[%s1851_s14 + $0x18c] ss:$16 sps:$4 sm:$0xff]   ;;  %v1688_v49 = vld [vmem:[%s1851_s14 + $0x180] ss:$16 sps:$4 sm:$0xff]   ;;  %v1689_v50 = vld [vmem:[%s1851_s14 + $0x188] ss:$16 sps:$4 sm:$0xff]  }
  0x27   : > { %v344_v47 = vld [vmem:[%s1846_s10 + $0x8] sm:$0xff]  ;;  %v1690_v51 = vld [vmem:[%s1851_s14 + $0x164] ss:$16 sps:$4 sm:$0xff]   ;;  %v1694_v53 = vld [vmem:[%s1851_s14 + $0x160] ss:$16 sps:$4 sm:$0xff]   ;;  %p1471_p7 = scmp.ne.s32.totalorder %s1768_s24, 2 }
  0x28   : > { %v346_v48 = vpack.c.bf16 %v344_v47, %v344_v47  ;;  %v1692_v52 = vld [vmem:[%s1851_s14 + $0x16c] ss:$16 sps:$4 sm:$0xff]   ;;  %v1695_v54 = vld [vmem:[%s1851_s14 + $0x168] ss:$16 sps:$4 sm:$0xff]   ;;  %v1696_v55 = vld [vmem:[%s1851_s14 + $0x144] ss:$16 sps:$4 sm:$0xff]  }
  0x29   : > { %740 = vmatpush1.bf16.msra.mxu0 %v1646_v19  ;;  %781 = vmatpush1.bf16.msra.mxu1 %v1647_v20  ;;  %v1698_v56 = vld [vmem:[%s1851_s14 + $0x14c] ss:$16 sps:$4 sm:$0xff]   ;;  %v1700_v57 = vld [vmem:[%s1851_s14 + $0x140] ss:$16 sps:$4 sm:$0xff]   ;;  %v1701_v58 = vld [vmem:[%s1851_s14 + $0x148] ss:$16 sps:$4 sm:$0xff]  }
  0x2a   : > { %741 = vmatprep.subr.bf16.mxu0 %v1648_v21  ;;  %782 = vmatprep.subr.bf16.mxu1 %v1650_v22  ;;  %v1702_v59 = vld [vmem:[%s1851_s14 + $0x124] ss:$16 sps:$4 sm:$0xff]   ;;  %v1704_v60 = vld [vmem:[%s1851_s14 + $0x12c] ss:$16 sps:$4 sm:$0xff]   ;;  %v1706_v61 = vld [vmem:[%s1851_s14 + $0x120] ss:$16 sps:$4 sm:$0xff]  }
  0x2b   : > { %763 = vmatprep.mubr.bf16.mxu0 %v346_v48  ;;  %804 = vmatprep.mubr.bf16.mxu1 %v346_v48  ;;  %v1707_v62 = vld [vmem:[%s1851_s14 + $0x128] ss:$16 sps:$4 sm:$0xff]   ;;  %v1708_v63 = vld [vmem:[%s1851_s14 + $0x104] ss:$16 sps:$4 sm:$0xff]   ;;  %v1710_v0 = vld [vmem:[%s1851_s14 + $0x10c] ss:$16 sps:$4 sm:$0xff]  }
  0x2c   : > { %v1712_v1 = vld [vmem:[%s1851_s14 + $0x100] ss:$16 sps:$4 sm:$0xff]   ;;  %v1713_v2 = vld [vmem:[%s1851_s14 + $0x108] ss:$16 sps:$4 sm:$0xff]  }
  0x2d   : > { %742 = vmatpush1.bf16.msra.mxu0 %v1652_v23  ;;  %783 = vmatpush1.bf16.msra.mxu1 %v1653_v24  ;;  %v343_v3 = vld [vmem:[%s1846_s10] sm:$0xff]  ;;  %v339_v5 = vld [vmem:[#allocation2 + $0x10] sm:$0xff]  ;;  %v341_v6 = vld [vmem:[#allocation2 + $0x18] sm:$0xff] }
  0x2e   : > { %743 = vmatprep.subr.bf16.mxu0 %v1654_v25  ;;  %784 = vmatprep.subr.bf16.mxu1 %v1656_v26  ;;  %v345_v4 = vpack.c.bf16 %v343_v3, %v343_v3  ;;  %v340_v9 = vld [vmem:[#allocation2] sm:$0xff]  ;;  %v342_v10 = vld [vmem:[#allocation2 + $0x8] sm:$0xff] }
  0x31   : > { %744 = vmatpush1.bf16.msra.mxu0 %v1658_v27  ;;  %785 = vmatpush1.bf16.msra.mxu1 %v1659_v28 }
  0x32   : > { %745 = vmatprep.subr.bf16.mxu0 %v1660_v29  ;;  %786 = vmatprep.subr.bf16.mxu1 %v1662_v30 }
  0x35   : > { %746 = vmatpush1.bf16.msra.mxu0 %v1664_v31  ;;  %787 = vmatpush1.bf16.msra.mxu1 %v1665_v32 }
  0x36   : > { %747 = vmatprep.subr.bf16.mxu0 %v1666_v33  ;;  %788 = vmatprep.subr.bf16.mxu1 %v1668_v34 }
  0x39   : > { %748 = vmatpush2.bf16.msra.mxu0 %v1670_v35  ;;  %789 = vmatpush2.bf16.msra.mxu1 %v1671_v36 }
  0x3a   : > { %749 = vmatprep.subr.bf16.mxu0 %v1672_v37  ;;  %790 = vmatprep.subr.bf16.mxu1 %v1674_v38 }
  0x3d   : > { %750 = vmatpush2.bf16.msra.mxu0 %v1676_v39  ;;  %791 = vmatpush2.bf16.msra.mxu1 %v1677_v40 }
  0x3e   : > { %751 = vmatprep.subr.bf16.mxu0 %v1678_v41  ;;  %792 = vmatprep.subr.bf16.mxu1 %v1680_v42 }
  0x41   : > { %752 = vmatpush2.bf16.msra.mxu0 %v1682_v43  ;;  %793 = vmatpush2.bf16.msra.mxu1 %v1683_v44 }
  0x42   : > { %753 = vmatprep.subr.bf16.mxu0 %v1684_v45  ;;  %794 = vmatprep.subr.bf16.mxu1 %v1686_v46 }
  0x45   : > { %754 = vmatpush2.bf16.msra.mxu0 %v1688_v49  ;;  %795 = vmatpush2.bf16.msra.mxu1 %v1689_v50 }
  0x46   : > { %755 = vmatprep.subr.bf16.mxu0 %v1690_v51  ;;  %796 = vmatprep.subr.bf16.mxu1 %v1692_v52 }
  0x49   : > { %756 = vmatpush2.bf16.msra.mxu0 %v1694_v53  ;;  %797 = vmatpush2.bf16.msra.mxu1 %v1695_v54 }
  0x4a   : > { %757 = vmatprep.subr.bf16.mxu0 %v1696_v55  ;;  %798 = vmatprep.subr.bf16.mxu1 %v1698_v56 }
  0x4d   : > { %758 = vmatpush2.bf16.msra.mxu0 %v1700_v57  ;;  %799 = vmatpush2.bf16.msra.mxu1 %v1701_v58 }
  0x4e   : > { %759 = vmatprep.subr.bf16.mxu0 %v1702_v59  ;;  %800 = vmatprep.subr.bf16.mxu1 %v1704_v60 }
  0x51   : > { %760 = vmatpush2.bf16.msra.mxu0 %v1706_v61  ;;  %801 = vmatpush2.bf16.msra.mxu1 %v1707_v62 }
  0x52   : > { %761 = vmatprep.subr.bf16.mxu0 %v1708_v63  ;;  %802 = vmatprep.subr.bf16.mxu1 %v1710_v0 }
  0x55   : > { %762 = vmatpush2.bf16.msra.mxu0 %v1712_v1  ;;  %803 = vmatpush2.bf16.msra.mxu1 %v1713_v2 }
  0x58   : > { %764 = vmatmul.mubr.bf16.vlgmr.msra.gmra.mxu0 %v345_v4  ;;  %805 = vmatmul.mubr.bf16.vlgmr.msra.gmra.mxu1 %v345_v4 }
 0x118   : > { %v765_v7 = vpop.f32.mrf.mxu0  ;;  %v806_v8 = vpop.f32.mrf.mxu1 }
 0x119   : > { %v813_v11 = vadd.f32 %v765_v7, %v339_v5  ;;  %v815_v12 = vadd.f32 %v806_v8, %v341_v6 }
 0x11a   : > { %v767_v13 = vpop.f32.mrf.mxu0  ;;  %v808_v14 = vpop.f32.mrf.mxu1  ;;  %824 = sbr.rel (%p1471_p7) target bundleno = 725 (0x2d5), region = 56 }
 0x11b   : > { %817 = vst [vmem:[#allocation2 + $0x10] sm:$0xff] %v813_v11  ;;  %819 = vst [vmem:[#allocation2 + $0x18] sm:$0xff] %v815_v12  ;;  %v814_v15 = vadd.f32 %v767_v13, %v340_v9  ;;  %v816_v16 = vadd.f32 %v808_v14, %v342_v10 }
 0x11c   : > { %v769_v17 = vpop.f32.mrf.mxu0  ;;  %v810_v18 = vpop.f32.mrf.mxu1 }
 0x11d   : > { %818 = vst [vmem:[#allocation2] sm:$0xff] %v814_v15  ;;  %820 = vst [vmem:[#allocation2 + $0x8] sm:$0xff] %v816_v16 }
 0x11e   : > { %v770_v19 = vpop.f32.mrf.mxu0  ;;  %v811_v20 = vpop.f32.mrf.mxu1 }
 0x11f   : > { %v1714_v21 = vld [vmem:[%s2065_s3 + $0x78] sm:$0xff]   ;;  %v1718_v25 = vld [vmem:[%s2065_s3 + $0x70] sm:$0xff]   ;;  %v1722_v29 = vld [vmem:[%s2065_s3 + $0x68] sm:$0xff]   ;;  %v831_v40 = vlaneseq  ;;  %v1779_v4 = vmov 0.0   ;;  %vm1780_vm0 = vmmov 0  }
 0x120   : > { %v1715_v22 = vld [vmem:[%s2065_s3 + $0xf8] sm:$0xff]   ;;  %1518 = vmatprep.subr.bf16.mxu0 %v1714_v21  ;;  %v1719_v26 = vld [vmem:[%s2065_s3 + $0xf0] sm:$0xff]   ;;  %v1723_v30 = vld [vmem:[%s2065_s3 + $0xe8] sm:$0xff]  }
 0x121   : > { %v1716_v23 = vld [vmem:[%s2065_s3 + $0x38] sm:$0xff]   ;;  %1540 = vmatprep.subr.bf16.mxu1 %v1715_v22  ;;  %v1720_v27 = vld [vmem:[%s2065_s3 + $0x30] sm:$0xff]   ;;  %v1724_v31 = vld [vmem:[%s2065_s3 + $0x28] sm:$0xff]   ;;  %v832_v45 = vshrl.u32 %v831_v40, 7 }
 0x122   : > { %v1717_v24 = vld [vmem:[%s2065_s3 + $0xb8] sm:$0xff]   ;;  %1519 = vmatpush3.bf16.msra.mxu0 %v1716_v23  ;;  %v1721_v28 = vld [vmem:[%s2065_s3 + $0xb0] sm:$0xff]   ;;  %v1725_v32 = vld [vmem:[%s2065_s3 + $0xa8] sm:$0xff]  }
 0x123   : > { %1541 = vmatpush3.bf16.msra.mxu1 %v1717_v24  ;;  %1520 = vmatprep.subr.bf16.mxu0 %v1718_v25  ;;  %v1726_v33 = vld [vmem:[%s2065_s3 + $0x60] sm:$0xff]   ;;  %v1730_v37 = vld [vmem:[%s2065_s3 + $0x58] sm:$0xff]   ;;  %v1734_v42 = vld [vmem:[%s2065_s3 + $0x50] sm:$0xff]   ;;  %v837_v50 = vsub.s32 1, %v832_v45  ;;  %v845_v52 = vsub.s32 3, %v832_v45  ;;  %v833_v54 = vsub.s32 0, %v832_v45 }
 0x124   : > { %1542 = vmatprep.subr.bf16.mxu1 %v1719_v26  ;;  %v1727_v34 = vld [vmem:[%s2065_s3 + $0xe0] sm:$0xff]   ;;  %v1731_v38 = vld [vmem:[%s2065_s3 + $0xd8] sm:$0xff]   ;;  %v1735_v43 = vld [vmem:[%s2065_s3 + $0xd0] sm:$0xff]   ;;  %v841_v56 = vsub.s32 2, %v832_v45 }
 0x125   : > { %v1728_v35 = vld [vmem:[%s2065_s3 + $0x20] sm:$0xff]   ;;  %v1732_v39 = vld [vmem:[%s2065_s3 + $0x18] sm:$0xff]   ;;  %v1736_v44 = vld [vmem:[%s2065_s3 + $0x10] sm:$0xff]  }
 0x126   : > { %1521 = vmatpush3.bf16.msra.mxu0 %v1720_v27  ;;  %v1729_v36 = vld [vmem:[%s2065_s3 + $0xa0] sm:$0xff]   ;;  %v1733_v41 = vld [vmem:[%s2065_s3 + $0x98] sm:$0xff]   ;;  %v1737_v46 = vld [vmem:[%s2065_s3 + $0x90] sm:$0xff]  }
 0x127   : > { %1543 = vmatpush3.bf16.msra.mxu1 %v1721_v28  ;;  %1522 = vmatprep.subr.bf16.mxu0 %v1722_v29  ;;  %v1738_v47 = vld [vmem:[%s2065_s3 + $0x48] sm:$0xff]   ;;  %v1742_v53 = vld [vmem:[%s2065_s3 + $0x40] sm:$0xff]   ;;  %v825_v0 = vld [vmem:[#allocation2 + $0x10] sm:$0xff] }
 0x128   : > { %1544 = vmatprep.subr.bf16.mxu1 %v1723_v30  ;;  %v1739_v48 = vld [vmem:[%s2065_s3 + $0xc8] sm:$0xff]   ;;  %v1743_v55 = vld [vmem:[%s2065_s3 + $0xc0] sm:$0xff]   ;;  %v827_v2 = vld [vmem:[#allocation2 + $0x18] sm:$0xff] }
 0x129   : > { %v1740_v49 = vld [vmem:[%s2065_s3 + $0x8] sm:$0xff]   ;;  %v1744_v57 = vld [vmem:[%s2065_s3] sm:$0xff]   ;;  %v1746_v17 = vld [vmem:[%s2067_s5 + $0x38] sm:$0xff]  }
 0x12a   : > { %1523 = vmatpush3.bf16.msra.mxu0 %v1724_v31  ;;  %v1741_v51 = vld [vmem:[%s2065_s3 + $0x88] sm:$0xff]   ;;  %v1745_v58 = vld [vmem:[%s2065_s3 + $0x80] sm:$0xff]   ;;  %v1747_v18 = vld [vmem:[%s2067_s5 + $0x30] sm:$0xff]  }
 0x12b   : > { %1545 = vmatpush3.bf16.msra.mxu1 %v1725_v32  ;;  %1524 = vmatprep.subr.bf16.mxu0 %v1726_v33  ;;  %v826_v59 = vld [vmem:[#allocation2] sm:$0xff]  ;;  %v828_v61 = vld [vmem:[#allocation2 + $0x8] sm:$0xff]  ;;  %v1750_v21 = vld [vmem:[%s2067_s5 + $0x18] sm:$0xff]  }
 0x12c   : > { %1546 = vmatprep.subr.bf16.mxu1 %v1727_v34  ;;  %v829_v60 = vld [vmem:[%s2064_s2] sm:$0xf]  ;;  %v1748_v19 = vld [vmem:[%s2067_s5 + $0x28] sm:$0xff]   ;;  %v1751_v22 = vld [vmem:[%s2067_s5 + $0x10] sm:$0xff]  }
 0x12d   : > { %v838_v62 = vrot.slane %v829_v60, %v837_v50  ;;  %v846_v63 = vrot.slane %v829_v60, %v845_v52  ;;  %v834_v1 = vrot.slane %v829_v60, %v833_v54  ;;  %v842_v3 = vrot.slane %v829_v60, %v841_v56  ;;  %v1749_v20 = vld [vmem:[%s2067_s5 + $0x20] sm:$0xff]   ;;  %v1752_v23 = vld [vmem:[%s2067_s5 + $0x8] sm:$0xff]  }
 0x12e   : > { %1525 = vmatpush3.bf16.msra.mxu0 %v1728_v35  ;;  %v1753_v24 = vld [vmem:[%s2067_s5] sm:$0xff]  }
 0x12f   : > { %1547 = vmatpush3.bf16.msra.mxu1 %v1729_v36  ;;  %1526 = vmatprep.subr.bf16.mxu0 %v1730_v37  ;;  %v852_v5 = vadd.f32 %v838_v62, %v826_v59  ;;  %v854_v6 = vadd.f32 %v846_v63, %v828_v61  ;;  %v851_v7 = vadd.f32 %v834_v1, %v825_v0  ;;  %v1472_v27 = vld [vmem:[%s2066_s4] ss:$0 sm:$0xff] }
 0x130   : > { %1548 = vmatprep.subr.bf16.mxu1 %v1731_v38  ;;  %v853_v8 = vadd.f32 %v842_v3, %v827_v2  ;;  %v1505_v40 = vld [vmem:[%s2068_s6] ss:$0 sm:$0xff] }
 0x131   : > { %v856_v9 = vmax.f32 %v852_v5, 0.0  ;;  %v858_v10 = vmax.f32 %v854_v6, 0.0  ;;  %v855_v11 = vmax.f32 %v851_v7, 0.0 }
 0x132   : > { %1527 = vmatpush3.bf16.msra.mxu0 %v1732_v39  ;;  %v857_v12 = vmax.f32 %v853_v8, 0.0 }
 0x133   : > { %1549 = vmatpush3.bf16.msra.mxu1 %v1733_v41  ;;  %1528 = vmatprep.subr.bf16.mxu0 %v1734_v42  ;;  %v860_v13 = vpack.c.bf16 %v856_v9, %v856_v9  ;;  %v862_v14 = vpack.c.bf16 %v858_v10, %v858_v10  ;;  %v859_v15 = vpack.c.bf16 %v855_v11, %v855_v11 }
 0x134   : > { %1550 = vmatprep.subr.bf16.mxu1 %v1735_v43  ;;  %v861_v16 = vpack.c.bf16 %v857_v12, %v857_v12 }
 0x135   : > { %1158 = vmatprep.mubr.bf16.mxu0 %v860_v13  ;;  %1198 = vmatprep.mubr.bf16.mxu1 %v862_v14 }
 0x136   : > { %1529 = vmatpush3.bf16.msra.mxu0 %v1736_v44 }
 0x137   : > { %1551 = vmatpush3.bf16.msra.mxu1 %v1737_v46  ;;  %1530 = vmatprep.subr.bf16.mxu0 %v1738_v47 }
 0x138   : > { %1552 = vmatprep.subr.bf16.mxu1 %v1739_v48 }
 0x13a   : > { %1531 = vmatpush3.bf16.msra.mxu0 %v1740_v49 }
 0x13b   : > { %1553 = vmatpush3.bf16.msra.mxu1 %v1741_v51  ;;  %1532 = vmatprep.subr.bf16.mxu0 %v1742_v53 }
 0x13c   : > { %1554 = vmatprep.subr.bf16.mxu1 %v1743_v55 }
 0x13e   : > { %1533 = vmatpush3.bf16.msra.mxu0 %v1744_v57 }
 0x13f   : > { %1555 = vmatpush3.bf16.msra.mxu1 %v1745_v58  ;;  %1571 = vmatprep.subr.bf16.mxu0 %v1779_v4 }
 0x141   : > { %1159 = vmatmul.mubr.bf16.vlgmr.msra.gmra.mxu0 %v859_v15 }
 0x142   : > { %1199 = vmatmul.mubr.bf16.vlgmr.msra.gmra.mxu1 %v861_v16  ;;  %1572 = vmatpush3.bf16.msra.mxu0 %v1746_v17 }
 0x143   : > { %1573 = vmatprep.subr.bf16.mxu0 %v1779_v4  ;;  %1587 = vmatprep.mubr.msk.bf16.mxu0 %vm1780_vm0, %v1779_v4 }
 0x146   : > { %1574 = vmatpush3.bf16.msra.mxu0 %v1747_v18 }
 0x147   : > { %1575 = vmatprep.subr.bf16.mxu0 %v1779_v4 }
 0x14a   : > { %1576 = vmatpush3.bf16.msra.mxu0 %v1748_v19 }
 0x14b   : > { %1577 = vmatprep.subr.bf16.mxu0 %v1779_v4 }
 0x14e   : > { %1578 = vmatpush3.bf16.msra.mxu0 %v1749_v20 }
 0x14f   : > { %1579 = vmatprep.subr.bf16.mxu0 %v1779_v4 }
 0x152   : > { %1580 = vmatpush3.bf16.msra.mxu0 %v1750_v21 }
 0x153   : > { %1581 = vmatprep.subr.bf16.mxu0 %v1779_v4 }
 0x156   : > { %1582 = vmatpush3.bf16.msra.mxu0 %v1751_v22 }
 0x157   : > { %1583 = vmatprep.subr.bf16.mxu0 %v1779_v4 }
 0x15a   : > { %1584 = vmatpush3.bf16.msra.mxu0 %v1752_v23 }
 0x15b   : > { %1585 = vmatprep.subr.bf16.mxu0 %v1779_v4 }
 0x15e   : > { %1586 = vmatpush3.bf16.msra.mxu0 %v1753_v24 }
 0x201   : > { %v1534_v25 = vpop.f32.mrf.mxu0 }
 0x202   : > { %v1556_v26 = vpop.f32.mrf.mxu1 }
 0x203   : > { %v1535_v28 = vpop.f32.mrf.mxu0 }
 0x204   : > { %v1557_v29 = vpop.f32.mrf.mxu1  ;;  %v1536_v30 = vadd.f32 %v1535_v28, %v1534_v25 }
 0x205   : > { %v1537_v31 = vpop.f32.mrf.mxu0  ;;  %v1558_v34 = vadd.f32 %v1557_v29, %v1556_v26 }
 0x206   : > { %v1559_v32 = vpop.f32.mrf.mxu1  ;;  %v1161_v33 = vadd.f32 %v1536_v30, %v1472_v27 }
 0x207   : > { %v1538_v35 = vpop.f32.mrf.mxu0 }
 0x208   : > { %v1560_v36 = vpop.f32.mrf.mxu1  ;;  %v1201_v37 = vadd.f32 %v1558_v34, %v1161_v33 }
 0x20a   : > { %v1206_v38 = vmax.f32 %v1201_v37, 0.0 }
 0x20c   : > { %v1207_v39 = vpack.c.bf16 %v1206_v38, %v1206_v38 }
 0x20e   : > { %1588 = vmatmul.mubr.bf16.vlgmr.msra.gmra.mxu0 %v1207_v39 }
 0x2ce   : > { %v1313_v41 = vpop.f32.mrf.mxu0 }
 0x2cf   : > { %v1314_v42 = vadd.f32 %v1505_v40, %v1313_v41 }
 0x2d0   : > { %v1589_v43 = vpop.f32.mrf.mxu0 }
 0x2d1   : > { %1319 = vst [vmem:[%s2069_s7] sm:$0xff] %v1314_v42 }
 0x2d2   : > { %v1316_v44 = vpop.f32.mrf.mxu0 }
 0x2d4   : > { %v1590_v45 = vpop.f32.mrf.mxu0 }
 0x2d5 PF: > { %s17_s26 = sadd.s32 1, %s1776_s26   ;;  %s2070_s24 = smov %s1772_s25 }
 0x2d6   : > { %p14_p8 = scmp.ge.s32.totalorder %s17_s26, 5   ;;  %s2071_s25 = smov %s2073_s27 }
 0x2d8   :  { %16 = sbr.rel (!%p14_p8) target bundleno = 2 (0x2), region = 89 }

</bundles_post_ra>
